<compile_context>
chip_gen: v6e
topology: v6e:2x2x1
jax: 0.10.0
libtpu: 0.0.40
codegen_flags: <defaults>
</compile_context>

<pallas_src>
import jax
import jax.numpy as jnp
from jax.experimental import pallas as pl
from jax.experimental.pallas import tpu as pltpu


def _round_up(x: int, m: int) -> int:
    return (x + m - 1) // m * m


def _embeddings_kernel(a_ref, w_ref, pos_ref, out_ref):
    """One (batch-block, M-tile) grid cell.

    a_ref:   (Bt, tm, K)      im2col patches; global row 0 of each image = zeros
    w_ref:   (K, E_pad)       flattened conv weight, E zero-padded to lanes
    pos_ref: (tm, E_pad)      position embeddings (row 0 += class embedding), f32
    out_ref: (Bt, tm, E_pad)
    """
    w = w_ref[...]
    pos = pos_ref[...]
    for bi in range(a_ref.shape[0]):      # Bt is small & static -> unrolled
        acc = jnp.dot(a_ref[bi], w, preferred_element_type=jnp.float32)
        out_ref[bi] = (acc + pos).astype(out_ref.dtype)


def clip_vision_embeddings(pixel_values, conv_weight, class_embedding,
                           pos_embedding, *, patch_size,
                           compute_dtype=jnp.bfloat16, out_dtype=None,
                           m_tile=512, batch_tile=4):
    """Forward pass of CLIPVisionEmbeddings.

    pixel_values:    (B, 3, H, W)   NCHW, PyTorch layout
    conv_weight:     (E, 3, P, P)   Conv2d(kernel=stride=P, bias=False) weight
    class_embedding: (E,)
    pos_embedding:   (num_patches + 1, E)
    compute_dtype:   dtype of the two big matmul operands (default bf16);
                     accumulation and the position add are always f32.
    out_dtype:       output dtype (default: pixel_values.dtype).
    Returns (B, num_patches + 1, E).
    """
    B, C, H, W = pixel_values.shape
    E = conv_weight.shape[0]
    P = int(patch_size)
    assert H % P == 0 and W % P == 0, "image size must be divisible by patch size"
    Hp, Wp = H // P, W // P
    Np = Hp * Wp
    Npos = Np + 1
    K = C * P * P

    cdt = jnp.dtype(compute_dtype)
    odt = jnp.dtype(out_dtype) if out_dtype is not None else pixel_values.dtype
    E_pad = _round_up(E, 128)      # lane-dense stores; K stays un-padded.

    # ---- im2col patchify (== conv with kernel=stride=P, no bias) -----------
    # Cast FIRST so the materialized LHS is compute_dtype-sized in HBM.
    # Flattening order (c, ph, pw) matches PyTorch's Conv2d weight.reshape.
    x = pixel_values.astype(cdt).reshape(B, C, Hp, P, Wp, P)
    x = jnp.transpose(x, (0, 2, 4, 1, 3, 5)).reshape(B, Np, K)
    # Global row 0 per image is zeros: the class token comes entirely from the
    # (augmented) position table, so no K padding / weight augmentation needed.
    a = jnp.concatenate([jnp.zeros((B, 1, K), cdt), x], axis=1)   # (B, Npos, K)

    # RHS: flattened conv weight, E padded to a lane multiple.
    w = conv_weight.astype(cdt).reshape(E, K).T                   # (K, E)
    w = jnp.pad(w, ((0, 0), (0, E_pad - E)))                      # (K, E_pad)

    # Position table stays f32 (added after f32 accumulation); fold the class
    # embedding into row 0 so output row 0 = 0-matmul + (pos[0] + cls).
    pos = pos_embedding.astype(jnp.float32)
    pos = pos.at[0].add(class_embedding.astype(jnp.float32))
    pos = jnp.pad(pos, ((0, 0), (0, E_pad - E)))                  # (Npos, E_pad)

    # ---- grid / tiling ------------------------------------------------------
    # Batch block: largest divisor of B not exceeding batch_tile.
    bt = 1
    for cand in range(min(int(batch_tile), B), 0, -1):
        if B % cand == 0:
            bt = cand
            break

    m_tile = max(16, _round_up(int(m_tile), 16))
    if Npos <= m_tile:
        tm, grid_m = Npos, 1                    # single full-extent M block
    else:
        n_m = pl.cdiv(Npos, m_tile)
        tm = _round_up(pl.cdiv(Npos, n_m), 16)  # balanced tiles, bf16-packed
        grid_m = pl.cdiv(Npos, tm)

    out = pl.pallas_call(
        _embeddings_kernel,
        out_shape=jax.ShapeDtypeStruct((B, Npos, E_pad), odt),
        grid_spec=pltpu.PrefetchScalarGridSpec(
            num_scalar_prefetch=0,
            grid=(B // bt, grid_m),
            in_specs=[
                pl.BlockSpec((bt, tm, K), lambda b, m: (b, m, 0)),
                pl.BlockSpec((K, E_pad), lambda b, m: (0, 0)),
                pl.BlockSpec((tm, E_pad), lambda b, m: (m, 0)),
            ],
            out_specs=pl.BlockSpec((bt, tm, E_pad), lambda b, m: (b, m, 0)),
        ),
        compiler_params=pltpu.CompilerParams(
            dimension_semantics=("parallel", "parallel"),
            vmem_limit_bytes=32 * 1024 * 1024,
        ),
    )(a, w, pos)

    if E_pad != E:
        out = out[..., :E]
    return out


def _reference(pixel_values, conv_weight, class_embedding, pos_embedding, patch_size):
    # Pure-JAX reference mirroring the PyTorch forward (conv via dot on patches).
    B, C, H, W = pixel_values.shape
    E = conv_weight.shape[0]
    P = patch_size
    Hp, Wp = H // P, W // P
    x = pixel_values.reshape(B, C, Hp, P, Wp, P)
    x = jnp.transpose(x, (0, 2, 4, 1, 3, 5)).reshape(B, Hp * Wp, C * P * P)
    patch_embeds = x @ conv_weight.reshape(E, -1).T          # (B, Np, E)
    cls = jnp.broadcast_to(class_embedding, (B, 1, E))
    emb = jnp.concatenate([cls, patch_embeds], axis=1)
    return emb + pos_embedding[None, :, :]


if __name__ == "__main__":
    # Small, config-consistent shapes: image_size=16, patch_size=8, hidden=32.
    # (Real CLIP shapes -- Np=196/256/576, K=588/768, E=768/1024 -- should be
    # used for any performance tuning; these sizes only validate correctness.)
    batch = 2
    channels = 3           # CLIP vision patch conv is fixed to 3 input channels
    image_size = 16
    patch_size = 8
    embed_dim = 32
    num_patches = (image_size // patch_size) ** 2
    num_positions = num_patches + 1

    key = jax.random.PRNGKey(0)
    k_pix, k_cls, k_conv, k_pos = jax.random.split(key, 4)

    pixel_values = jax.random.normal(
        k_pix, (batch, channels, image_size, image_size), dtype=jnp.float32)
    class_embedding = jax.random.normal(k_cls, (embed_dim,), dtype=jnp.float32)
    conv_weight = jax.random.normal(
        k_conv, (embed_dim, channels, patch_size, patch_size), dtype=jnp.float32) * 0.02
    pos_embedding = jax.random.normal(
        k_pos, (num_positions, embed_dim), dtype=jnp.float32) * 0.02

    fwd = jax.jit(clip_vision_embeddings,
                  static_argnames=("patch_size", "compute_dtype", "out_dtype",
                                   "m_tile", "batch_tile"))

    ref = _reference(pixel_values, conv_weight, class_embedding, pos_embedding,
                     patch_size)

    # Default path: bf16 operands, f32 accumulation, f32 output.
    out = jax.block_until_ready(
        fwd(pixel_values, conv_weight, class_embedding, pos_embedding,
            patch_size=patch_size))
    assert out.shape == (batch, num_positions, embed_dim), out.shape
    assert jnp.allclose(out, ref, atol=5e-2, rtol=5e-2), "bf16 mismatch vs reference"

    # f32 compute path: strict check against the pure-JAX reference.
    out_f32 = jax.block_until_ready(
        fwd(pixel_values, conv_weight, class_embedding, pos_embedding,
            patch_size=patch_size, compute_dtype=jnp.float32))
    assert out_f32.shape == (batch, num_positions, embed_dim), out_f32.shape
    assert jnp.allclose(out_f32, ref, atol=1e-4, rtol=1e-4), "f32 mismatch vs reference"

    print("KERNEL_OK")
</pallas_src>

<mosaic_0001>
module attributes {stable_mosaic.version = 11 : i64} {
  func.func @_embeddings_kernel(%arg0: i32, %arg1: i32, %arg2: memref<2x5x192xbf16, #tpu.memory_space<vmem>>, %arg3: memref<192x128xbf16, #tpu.memory_space<vmem>>, %arg4: memref<5x128xf32, #tpu.memory_space<vmem>>, %arg5: memref<2x5x128xf32, #tpu.memory_space<vmem>>) attributes {dimension_semantics = [#tpu.dimension_semantics<parallel>, #tpu.dimension_semantics<parallel>], iteration_bounds = array<i64: 1, 1>, scalar_prefetch = 0 : i64, scratch_operands = 0 : i64, tpu.core_type = #tpu.core_type<tc>, window_params = [{transform_indices = @transform_0, window_bounds = array<i64: 2, 5, 192>}, {pipeline_mode = #tpu.pipeline_mode<synchronous>, transform_indices = @transform_1, window_bounds = array<i64: 192, 128>}, {transform_indices = @transform_2, window_bounds = array<i64: 5, 128>}, {transform_indices = @transform_3, window_bounds = array<i64: 2, 5, 128>}]} {
    %c0 = arith.constant 0 : index
    %c0_0 = arith.constant 0 : index
    %0 = vector.load %arg3[%c0, %c0_0] : memref<192x128xbf16, #tpu.memory_space<vmem>>, vector<192x128xbf16>
    %c0_1 = arith.constant 0 : index
    %c0_2 = arith.constant 0 : index
    %1 = vector.load %arg4[%c0_1, %c0_2] : memref<5x128xf32, #tpu.memory_space<vmem>>, vector<5x128xf32>
    %c0_3 = arith.constant 0 : index
    %c0_4 = arith.constant 0 : index
    %c0_5 = arith.constant 0 : index
    %2 = vector.load %arg2[%c0_3, %c0_4, %c0_5] : memref<2x5x192xbf16, #tpu.memory_space<vmem>>, vector<1x5x192xbf16>
    %3 = vector.shape_cast %2 : vector<1x5x192xbf16> to vector<5x192xbf16>
    %cst = arith.constant dense<0.000000e+00> : vector<5x128xf32>
    %4 = tpu.matmul %3, %0, %cst {dimension_numbers = #tpu.dot_dimension_numbers<[1], [0], [0], [1], [0, 0, 1, 1], [], []>} : vector<5x192xbf16>, vector<192x128xbf16>, vector<5x128xf32> -> vector<5x128xf32>
    %5 = arith.addf %4, %1 : vector<5x128xf32>
    %c0_6 = arith.constant 0 : index
    %c0_7 = arith.constant 0 : index
    %c0_8 = arith.constant 0 : index
    %6 = vector.load %arg5[%c0_6, %c0_7, %c0_8] : memref<2x5x128xf32, #tpu.memory_space<vmem>>, vector<1x5x128xf32>
    %7 = vector.shape_cast %6 : vector<1x5x128xf32> to vector<5x128xf32>
    %8 = vector.shape_cast %5 : vector<5x128xf32> to vector<1x5x128xf32>
    tpu.vector_store %arg5[%c0_6, %c0_7, %c0_8], %8 {strides = array<i32>} : memref<2x5x128xf32, #tpu.memory_space<vmem>>, vector<1x5x128xf32>,
    %c1 = arith.constant 1 : index
    %c0_9 = arith.constant 0 : index
    %c0_10 = arith.constant 0 : index
    %9 = vector.load %arg2[%c1, %c0_9, %c0_10] : memref<2x5x192xbf16, #tpu.memory_space<vmem>>, vector<1x5x192xbf16>
    %10 = vector.shape_cast %9 : vector<1x5x192xbf16> to vector<5x192xbf16>
    %cst_11 = arith.constant dense<0.000000e+00> : vector<5x128xf32>
    %11 = tpu.matmul %10, %0, %cst_11 {dimension_numbers = #tpu.dot_dimension_numbers<[1], [0], [0], [1], [0, 0, 1, 1], [], []>} : vector<5x192xbf16>, vector<192x128xbf16>, vector<5x128xf32> -> vector<5x128xf32>
    %12 = arith.addf %11, %1 : vector<5x128xf32>
    %c1_12 = arith.constant 1 : index
    %c0_13 = arith.constant 0 : index
    %c0_14 = arith.constant 0 : index
    %13 = vector.load %arg5[%c1_12, %c0_13, %c0_14] : memref<2x5x128xf32, #tpu.memory_space<vmem>>, vector<1x5x128xf32>
    %14 = vector.shape_cast %13 : vector<1x5x128xf32> to vector<5x128xf32>
    %15 = vector.shape_cast %12 : vector<5x128xf32> to vector<1x5x128xf32>
    tpu.vector_store %arg5[%c1_12, %c0_13, %c0_14], %15 {strides = array<i32>} : memref<2x5x128xf32, #tpu.memory_space<vmem>>, vector<1x5x128xf32>,
    return
  }
  func.func @transform_0(%arg0: i32, %arg1: i32) -> (i32, i32, i32) {
    %c0_i32 = arith.constant 0 : i32
    %c0_i32_0 = arith.constant 0 : i32
    return %arg0, %arg1, %c0_i32 : i32, i32, i32
  }
  func.func @transform_1(%arg0: i32, %arg1: i32) -> (i32, i32) {
    %c0_i32 = arith.constant 0 : i32
    %c0_i32_0 = arith.constant 0 : i32
    %c0_i32_1 = arith.constant 0 : i32
    return %c0_i32, %c0_i32_0 : i32, i32
  }
  func.func @transform_2(%arg0: i32, %arg1: i32) -> (i32, i32) {
    %c0_i32 = arith.constant 0 : i32
    %c0_i32_0 = arith.constant 0 : i32
    return %arg1, %c0_i32 : i32, i32
  }
  func.func @transform_3(%arg0: i32, %arg1: i32) -> (i32, i32, i32) {
    %c0_i32 = arith.constant 0 : i32
    %c0_i32_0 = arith.constant 0 : i32
    return %arg0, %arg1, %c0_i32 : i32, i32, i32
  }
}

</mosaic_0001>

<bundles_post_ra>
// kernel: clip_vision_embeddings.1
= control target key start
LH: loop header
LB: loop body
LE: loop exit
PB: predicated region body
PF: predicated region fallthrough
CT: control target
= control target key end

     0   :  { %v258_v0 = vmov 0   ;;  %vm119_vm0 = vcmask 523264   ;;  %s354_s1 = inlined_call_operand.vmem [shape: bf16[192,128], index: 1, kind: input, shape index: {}]   ;;  %s355_s0 = inlined_call_operand.vmem [shape: bf16[2,5,192], index: 0, kind: input, shape index: {}]   ;;  %s356_s2 = inlined_call_operand.vmem [shape: f32[5,128], index: 2, kind: input, shape index: {}]   ;;  %s357_s3 = inlined_call_operand.vmem [shape: f32[2,5,128], index: 3, kind: output, shape index: {}]  }
   0x1   :  { %123 = vmatprep.subr.bf16.mxu0 %v258_v0  ;;  %175 = vmatprep.subr.bf16.mxu1 %v258_v0  ;;  %v242_v1 = vld [vmem:[%s354_s1 + $0x38] sm:$0xff]   ;;  %v243_v2 = vld [vmem:[%s354_s1 + $0x30] sm:$0xff]   ;;  %v244_v3 = vld [vmem:[%s354_s1 + $0x28] sm:$0xff]  }
   0x2   :  { %124 = vmatpush1.bf16.msra.mxu0 %v242_v1  ;;  %176 = vmatpush1.bf16.msra.mxu1 %v242_v1  ;;  %v245_v4 = vld [vmem:[%s354_s1 + $0x20] sm:$0xff]   ;;  %v236_v6 = vld [vmem:[%s355_s0 + $0x8] sm:$0x77]  ;;  %v246_v9 = vld [vmem:[%s354_s1 + $0x18] sm:$0xff]  }
   0x3   :  { %125 = vmatprep.subr.bf16.mxu0 %v258_v0  ;;  %177 = vmatprep.subr.bf16.mxu1 %v258_v0  ;;  %v40_v5 = vld [vmem:[%s355_s0] sm:$0x77]  ;;  %v238_v8 = vcombine.high %v236_v6, %v236_v6  ;;  %v247_v10 = vld [vmem:[%s354_s1 + $0x10] sm:$0xff]   ;;  %v248_v11 = vld [vmem:[%s354_s1 + $0x8] sm:$0xff]   ;;  %v237_v18 = vcombine.low %v236_v6, %v236_v6 }
   0x4   :  { %v222_v7 = vcombine.high %v40_v5, %v40_v5  ;;  %v249_v12 = vld [vmem:[%s354_s1] sm:$0xff]   ;;  %v250_v13 = vld [vmem:[%s354_s1 + $0x58] sm:$0xff]   ;;  %v251_v14 = vld [vmem:[%s354_s1 + $0x50] sm:$0xff]   ;;  %v221_v17 = vcombine.low %v40_v5, %v40_v5 }
   0x5   :  { %239 = vmatprep.mubr.msk.bf16.mxu1 %vm119_vm0, %v238_v8  ;;  %v252_v15 = vld [vmem:[%s354_s1 + $0x48] sm:$0xff]   ;;  %v253_v16 = vld [vmem:[%s354_s1 + $0x40] sm:$0xff]  }
   0x6   :  { %126 = vmatpush1.bf16.msra.mxu0 %v243_v2  ;;  %178 = vmatpush1.bf16.msra.mxu1 %v243_v2  ;;  %v39_v19 = vld [vmem:[%s356_s2] sm:$0x1f] }
   0x7   :  { %127 = vmatprep.subr.bf16.mxu0 %v258_v0  ;;  %179 = vmatprep.subr.bf16.mxu1 %v258_v0 }
   0x8   :  { %235 = vmatprep.mubr.msk.bf16.mxu0 %vm119_vm0, %v222_v7 }
   0xa   :  { %128 = vmatpush1.bf16.msra.mxu0 %v244_v3  ;;  %180 = vmatpush1.bf16.msra.mxu1 %v244_v3 }
   0xb   :  { %129 = vmatprep.subr.bf16.mxu0 %v258_v0  ;;  %181 = vmatprep.subr.bf16.mxu1 %v258_v0 }
   0xe   :  { %130 = vmatpush1.bf16.msra.mxu0 %v245_v4  ;;  %182 = vmatpush1.bf16.msra.mxu1 %v245_v4 }
   0xf   :  { %131 = vmatprep.subr.bf16.mxu0 %v258_v0  ;;  %183 = vmatprep.subr.bf16.mxu1 %v258_v0 }
  0x12   :  { %132 = vmatpush1.bf16.msra.mxu0 %v246_v9  ;;  %184 = vmatpush1.bf16.msra.mxu1 %v246_v9 }
  0x13   :  { %133 = vmatprep.subr.bf16.mxu0 %v258_v0  ;;  %185 = vmatprep.subr.bf16.mxu1 %v258_v0 }
  0x16   :  { %134 = vmatpush1.bf16.msra.mxu0 %v247_v10  ;;  %186 = vmatpush1.bf16.msra.mxu1 %v247_v10 }
  0x17   :  { %135 = vmatprep.subr.bf16.mxu0 %v258_v0  ;;  %187 = vmatprep.subr.bf16.mxu1 %v258_v0 }
  0x1a   :  { %136 = vmatpush1.bf16.msra.mxu0 %v248_v11  ;;  %188 = vmatpush1.bf16.msra.mxu1 %v248_v11 }
  0x1b   :  { %137 = vmatprep.subr.bf16.mxu0 %v258_v0  ;;  %189 = vmatprep.subr.bf16.mxu1 %v258_v0 }
  0x1e   :  { %138 = vmatpush1.bf16.msra.mxu0 %v249_v12  ;;  %190 = vmatpush1.bf16.msra.mxu1 %v249_v12 }
  0x1f   :  { %147 = vmatprep.subr.bf16.mxu0 %v258_v0  ;;  %199 = vmatprep.subr.bf16.mxu1 %v258_v0 }
  0x22   :  { %148 = vmatpush2.bf16.msra.mxu0 %v250_v13  ;;  %200 = vmatpush2.bf16.msra.mxu1 %v250_v13 }
  0x23   :  { %149 = vmatprep.subr.bf16.mxu0 %v258_v0  ;;  %201 = vmatprep.subr.bf16.mxu1 %v258_v0 }
  0x26   :  { %150 = vmatpush2.bf16.msra.mxu0 %v251_v14  ;;  %202 = vmatpush2.bf16.msra.mxu1 %v251_v14 }
  0x27   :  { %151 = vmatprep.subr.bf16.mxu0 %v258_v0  ;;  %203 = vmatprep.subr.bf16.mxu1 %v258_v0 }
  0x2a   :  { %152 = vmatpush2.bf16.msra.mxu0 %v252_v15  ;;  %204 = vmatpush2.bf16.msra.mxu1 %v252_v15 }
  0x2b   :  { %153 = vmatprep.subr.bf16.mxu0 %v258_v0  ;;  %205 = vmatprep.subr.bf16.mxu1 %v258_v0 }
  0x2e   :  { %154 = vmatpush2.bf16.msra.mxu0 %v253_v16  ;;  %206 = vmatpush2.bf16.msra.mxu1 %v253_v16 }
  0x31   :  { %156 = vmatmul.mubr.bf16.vlgmr.msra.gmra.mxu0 %v221_v17  ;;  %208 = vmatmul.mubr.bf16.vlgmr.msra.gmra.mxu1 %v237_v18 }
  0xf1   :  { %v157_v20 = vpop.f32.mrf.mxu0  ;;  %v209_v21 = vpop.f32.mrf.mxu1 }
  0xf2   :  { %v158_v22 = vadd.f32 %v157_v20, %v39_v19  ;;  %v210_v23 = vadd.f32 %v209_v21, %v39_v19 }
  0xf3   :  { %v159_v24 = vpop.f32.mrf.mxu0  ;;  %v211_v25 = vpop.f32.mrf.mxu1 }
  0xf4   :  { %163 = vst [vmem:[%s357_s3] sm:$0x1f] %v158_v22  ;;  %240 = vst [vmem:[%s357_s3 + $0x8] sm:$0x1f] %v210_v23 }
  0xf5   :  { %v160_v26 = vpop.f32.mrf.mxu0  ;;  %v212_v27 = vpop.f32.mrf.mxu1 }
  0xf7   :  { %v161_v28 = vpop.f32.mrf.mxu0  ;;  %v213_v29 = vpop.f32.mrf.mxu1 }

</bundles_post_ra>
